<compile_context>
chip_gen: v5e
topology: v5e:2x2
jax: 0.10.0
libtpu: 0.0.40
codegen_flags: <defaults>
</compile_context>

<pallas_src>
import functools
import numpy as np

import jax
import jax.numpy as jnp
from jax import lax
from jax.experimental import pallas as pl
from jax.experimental.pallas import tpu as pltpu

BN_EPS = 1e-5
TK_CAP = 2048                          # max K-tile (rows of W / cols of X)
VMEM_LIMIT_BYTES = 32 * 1024 * 1024    # explicit: > v5e 16MiB default, <= v7x 32MiB default
_BUFFERED_OK = hasattr(pl, "Buffered")  # 3-deep weight multibuffering, if supported


def _round_up(v, m):
    return ((v + m - 1) // m) * m


def _largest_divisor_tile(size, cap):
    """Largest multiple of 128 that divides `size` (a multiple of 128) and is <= cap."""
    units = size // 128
    cap_units = max(cap // 128, 1)
    best = 1
    for d in range(1, min(units, cap_units) + 1):
        if units % d == 0:
            best = d
    return best * 128


def _pick_kn_tiles(K, N):
    """Weight-side tiling that depends only on (K, N) so weights can be pre-padded once.

    The K tile divides round_up(K, 128) exactly -> zero K overshoot (the old heuristic
    padded K by up to 78% of pure zero DMA on the deep, weight-streaming conv blocks).
    """
    k_pad = _round_up(K, 128)
    tk = _largest_divisor_tile(k_pad, TK_CAP)
    if tk < 512 and k_pad > TK_CAP:
        # Awkward (prime-ish) K: allow <= 1 extra tile of overshoot instead of tiny tiles.
        nk = (k_pad + TK_CAP - 1) // TK_CAP
        tk = _round_up((k_pad + nk - 1) // nk, 128)
        k_pad = nk * tk

    n_pad = _round_up(N, 128)
    if n_pad >= 2048:
        n_cap = 1024     # >= 2 N blocks -> both v7x TensorCores stream weights concurrently
    elif n_pad >= 1024:
        n_cap = 512
    else:
        n_cap = n_pad
    tn = _largest_divisor_tile(n_pad, n_cap)
    return tk, tn, k_pad, n_pad


def _pick_m_tile(M):
    m_pad = _round_up(max(M, 1), 8)
    if m_pad > 256:
        tm = 256
        m_pad = _round_up(M, tm)
    else:
        tm = m_pad
    return tm, m_pad


# -----------------------------------------------------------------------------
# Pallas kernels: fused   out = act(X @ W + shift)
# (eval-mode BN scale is pre-folded into W's columns at prepare time)
# -----------------------------------------------------------------------------
def _mm_kernel_single(x_ref, w_ref, shift_ref, o_ref, *, activation):
    # Whole K in one tile: direct store, no zero-init / accumulate read-modify-write.
    y = jnp.dot(x_ref[...], w_ref[...], preferred_element_type=jnp.float32)
    y = y + shift_ref[...]
    if activation == "relu":
        y = jnp.maximum(y, 0.0)
    o_ref[...] = y.astype(o_ref.dtype)


def _mm_kernel_multi(x_ref, w_ref, shift_ref, o_ref, acc_ref, *, activation):
    k = pl.program_id(2)

    @pl.when(k == 0)
    def _():
        acc_ref[...] = jnp.zeros_like(acc_ref)

    acc_ref[...] += jnp.dot(x_ref[...], w_ref[...],
                            preferred_element_type=jnp.float32)

    @pl.when(k == pl.num_programs(2) - 1)
    def _():
        y = acc_ref[...] + shift_ref[...]
        if activation == "relu":
            y = jnp.maximum(y, 0.0)
        o_ref[...] = y.astype(o_ref.dtype)


def _run_matmul(xp, wp, sh, tm, tn, tk, m_pad, n_pad, nk,
                activation, out_dtype, buffered):
    if nk == 1:
        return pl.pallas_call(
            functools.partial(_mm_kernel_single, activation=activation),
            out_shape=jax.ShapeDtypeStruct((m_pad, n_pad), out_dtype),
            grid_spec=pltpu.PrefetchScalarGridSpec(
                num_scalar_prefetch=0,
                grid=(m_pad // tm, n_pad // tn),
                in_specs=[pl.BlockSpec((tm, tk), lambda i, j: (i, 0)),
                          pl.BlockSpec((tk, tn), lambda i, j: (0, j)),
                          pl.BlockSpec((1, tn), lambda i, j: (0, j))],
                out_specs=pl.BlockSpec((tm, tn), lambda i, j: (i, j)),
            ),
            compiler_params=pltpu.CompilerParams(
                dimension_semantics=("parallel", "parallel"),
                vmem_limit_bytes=VMEM_LIMIT_BYTES),
        )(xp, wp, sh)

    if buffered:
        w_spec = pl.BlockSpec((tk, tn), lambda i, j, k: (k, j),
                              pipeline_mode=pl.Buffered(3))
    else:
        w_spec = pl.BlockSpec((tk, tn), lambda i, j, k: (k, j))

    return pl.pallas_call(
        functools.partial(_mm_kernel_multi, activation=activation),
        out_shape=jax.ShapeDtypeStruct((m_pad, n_pad), out_dtype),
        grid_spec=pltpu.PrefetchScalarGridSpec(
            num_scalar_prefetch=0,
            grid=(m_pad // tm, n_pad // tn, nk),
            in_specs=[pl.BlockSpec((tm, tk), lambda i, j, k: (i, k)),
                      w_spec,
                      pl.BlockSpec((1, tn), lambda i, j, k: (0, j))],
            out_specs=pl.BlockSpec((tm, tn), lambda i, j, k: (i, j)),
            scratch_shapes=[pltpu.VMEM((tm, tn), jnp.float32)]),
        compiler_params=pltpu.CompilerParams(
            dimension_semantics=("parallel", "parallel", "arbitrary"),
            vmem_limit_bytes=VMEM_LIMIT_BYTES),
    )(xp, wp, sh)


def fused_matmul_prepared(x, prep, activation="none", out_dtype=jnp.float32):
    """x: (M, K) f32/bf16.  prep: pre-padded bf16 (k_pad, n_pad) weight (BN scale folded in)
    plus padded f32 per-column shift and static tiling metadata."""
    global _BUFFERED_OK
    M, K = x.shape
    assert K == prep["K"]
    N, tk, tn = prep["N"], prep["tk"], prep["tn"]
    k_pad, n_pad = prep["k_pad"], prep["n_pad"]
    tm, m_pad = _pick_m_tile(M)

    # Zero-pad activations (keeps the K accumulation exact), cast to bf16 for the MXU.
    xp = jnp.pad(x, ((0, m_pad - M), (0, k_pad - K))).astype(jnp.bfloat16)
    nk = k_pad // tk

    if _BUFFERED_OK and nk >= 3:
        try:
            out = _run_matmul(xp, prep["w"], prep["shift"], tm, tn, tk,
                              m_pad, n_pad, nk, activation, out_dtype, buffered=True)
            jax.block_until_ready(out)   # surface lowering failures here, not later
        except Exception:
            _BUFFERED_OK = False
            out = _run_matmul(xp, prep["w"], prep["shift"], tm, tn, tk,
                              m_pad, n_pad, nk, activation, out_dtype, buffered=False)
    else:
        out = _run_matmul(xp, prep["w"], prep["shift"], tm, tn, tk,
                          m_pad, n_pad, nk, activation, out_dtype, buffered=False)
    return out[:M, :N]


# -----------------------------------------------------------------------------
# Pallas kernel: global pooling head
#   x: (B, C, T, F) ->  mean over F, then max over T + mean over T  -> (B, C)
# -----------------------------------------------------------------------------
def _head_pool_kernel(x_ref, o_ref):
    x = x_ref[...].astype(jnp.float32)   # (B, T, F, C), channels on lanes
    m = jnp.mean(x, axis=2)              # (B, T, C)  mean over freq
    o_ref[...] = jnp.max(m, axis=1) + jnp.mean(m, axis=1)


def head_pool(x_nchw):
    B, C, T, Fq = x_nchw.shape
    xt = jnp.transpose(x_nchw, (0, 2, 3, 1))          # (B, T, F, C)
    return pl.pallas_call(
        _head_pool_kernel,
        out_shape=jax.ShapeDtypeStruct((B, C), jnp.float32),
        in_specs=[pl.BlockSpec(memory_space=pltpu.MemorySpace.VMEM)],
        out_specs=pl.BlockSpec(memory_space=pltpu.MemorySpace.VMEM),
    )(xt)


# -----------------------------------------------------------------------------
# One-time weight preparation: fold BN, transpose to (K, N), pad, cast to bf16
# -----------------------------------------------------------------------------
def _bn_fold(bn):
    scale = bn["gamma"] / jnp.sqrt(bn["var"] + BN_EPS)
    shift = bn["beta"] - bn["mean"] * scale
    return scale, shift


def _prep_matmul(W, shift):
    K, N = W.shape
    tk, tn, k_pad, n_pad = _pick_kn_tiles(K, N)
    wp = jnp.pad(W.astype(jnp.float32),
                 ((0, k_pad - K), (0, n_pad - N))).astype(jnp.bfloat16)
    sh = jnp.pad(shift.astype(jnp.float32), (0, n_pad - N)).reshape(1, n_pad)
    return dict(w=wp, shift=sh, K=K, N=N, tk=tk, tn=tn, k_pad=k_pad, n_pad=n_pad)


def prep_conv1d(weight, bn):
    # weight: (O, C, k) torch Conv1d layout, bias=False
    O, C, k = weight.shape
    scale, shift = _bn_fold(bn)
    W = weight.reshape(O, C * k).T * scale[None, :]         # (C*k, O), BN scale folded
    prep = _prep_matmul(W, shift)
    prep["ksize"] = k
    return prep


def prep_conv2d(weight, bn):
    # weight: (O, C, 3, 3), stride 1, padding 1, bias=False
    O, C, kh, kw = weight.shape
    scale, shift = _bn_fold(bn)
    W = weight.reshape(O, C * kh * kw).T * scale[None, :]   # (C*9, O), BN scale folded
    return _prep_matmul(W, shift)


def prep_linear(wb):
    w, b = wb
    return _prep_matmul(w, b)


def prepare_params(params):
    def conv1d_pair(blk):
        return dict(conv1=prep_conv1d(blk["conv1_w"], blk["bn1"]),
                    conv2=prep_conv1d(blk["conv2_w"], blk["bn2"]))

    def conv2d_pair(blk):
        return dict(conv1=prep_conv2d(blk["conv1_w"], blk["bn1"]),
                    conv2=prep_conv2d(blk["conv2_w"], blk["bn2"]))

    prep = dict(
        pre_conv0=prep_conv1d(params["pre_conv0_w"], params["pre_bn0"]),
        pre_block1=conv1d_pair(params["pre_block1"]),
        pre_block2=conv1d_pair(params["pre_block2"]),
        pre_block3=conv1d_pair(params["pre_block3"]),
        pre_block4=conv2d_pair(params["pre_block4"]),
        conv_block2=conv2d_pair(params["conv_block2"]),
        conv_block3=conv2d_pair(params["conv_block3"]),
        conv_block4=conv2d_pair(params["conv_block4"]),
        conv_block5=conv2d_pair(params["conv_block5"]),
        conv_block6=conv2d_pair(params["conv_block6"]),
        fc1=prep_linear(params["fc1"]),
        fc_transfer=prep_linear(params["fc_transfer"]),
    )
    # Materialize repacked weights now so per-forward cost excludes weight repacking.
    arrays = [l for l in jax.tree_util.tree_leaves(prep)
              if hasattr(l, "block_until_ready")]
    jax.block_until_ready(arrays)
    return prep


# -----------------------------------------------------------------------------
# Conv / pooling glue (im2col in plain JAX; matmul + BN shift + ReLU in Pallas)
# -----------------------------------------------------------------------------
def conv1d_bn_relu(x, prep, stride, padding, dilation):
    # x: (B, C, L)
    B, C, L = x.shape
    k = prep["ksize"]
    O = prep["N"]
    xp = jnp.pad(x, ((0, 0), (0, 0), (padding, padding)))
    Lp = L + 2 * padding
    out_len = (Lp - dilation * (k - 1) - 1) // stride + 1
    cols = []
    for i in range(k):
        start = i * dilation
        limit = start + stride * (out_len - 1) + 1
        cols.append(lax.slice(xp, (0, 0, start), (B, C, limit), (1, 1, stride)))
    patches = jnp.stack(cols, axis=2)                               # (B, C, k, L_out)
    X = jnp.transpose(patches, (0, 3, 1, 2)).reshape(B * out_len, C * k)
    y = fused_matmul_prepared(X, prep, activation="relu", out_dtype=jnp.bfloat16)
    return jnp.transpose(y.reshape(B, out_len, O), (0, 2, 1))       # (B, O, L_out)


def conv2d_bn_relu(x, prep):
    # x: (B, C, H, W), 3x3 conv, stride 1, padding 1
    B, C, H, W_ = x.shape
    O = prep["N"]
    xp = jnp.pad(x, ((0, 0), (0, 0), (1, 1), (1, 1)))
    cols = []
    for kh in range(3):
        for kw in range(3):
            cols.append(xp[:, :, kh:kh + H, kw:kw + W_])
    patches = jnp.stack(cols, axis=2)                               # (B, C, 9, H, W)
    X = jnp.transpose(patches, (0, 3, 4, 1, 2)).reshape(B * H * W_, C * 9)
    y = fused_matmul_prepared(X, prep, activation="relu", out_dtype=jnp.bfloat16)
    return jnp.transpose(y.reshape(B, H, W_, O), (0, 3, 1, 2))


def max_pool1d(x, k):
    B, C, L = x.shape
    Lo = L // k
    return x[:, :, :Lo * k].reshape(B, C, Lo, k).max(axis=3)


def avg_pool2d(x, kh, kw):
    B, C, H, W_ = x.shape
    Ho, Wo = H // kh, W_ // kw
    return x[:, :, :Ho * kh, :Wo * kw].reshape(B, C, Ho, kh, Wo, kw).mean(axis=(3, 5))


def conv_pre_wav_block(x, blk, pool_size):
    x = conv1d_bn_relu(x, blk["conv1"], stride=1, padding=1, dilation=1)
    x = conv1d_bn_relu(x, blk["conv2"], stride=1, padding=2, dilation=2)
    return max_pool1d(x, pool_size)


def conv_block(x, blk, pool_size):
    x = conv2d_bn_relu(x, blk["conv1"])
    x = conv2d_bn_relu(x, blk["conv2"])
    return avg_pool2d(x, pool_size[0], pool_size[1])


# -----------------------------------------------------------------------------
# Deterministic parameter init (shapes follow Wavegram_Cnn14 + fc_transfer)
# -----------------------------------------------------------------------------
def init_params(key, num_classes):
    keys = iter(jax.random.split(key, 128))

    def conv1d_w(o, c, k):
        return (jax.random.normal(next(keys), (o, c, k), jnp.float32)
                * np.sqrt(2.0 / (c * k)))

    def conv2d_w(o, c):
        return (jax.random.normal(next(keys), (o, c, 3, 3), jnp.float32)
                * np.sqrt(2.0 / (c * 9)))

    def bn(c):
        return dict(
            gamma=jnp.ones((c,), jnp.float32)
            + 0.05 * jax.random.normal(next(keys), (c,), jnp.float32),
            beta=0.05 * jax.random.normal(next(keys), (c,), jnp.float32),
            mean=jnp.zeros((c,), jnp.float32),
            var=jnp.ones((c,), jnp.float32),
        )

    def linear(i, o):
        w = jax.random.normal(next(keys), (i, o), jnp.float32) * np.sqrt(1.0 / i)
        b = 0.01 * jax.random.normal(next(keys), (o,), jnp.float32)
        return (w, b)

    def pre_wav_block(ci, co):
        return dict(conv1_w=conv1d_w(co, ci, 3), bn1=bn(co),
                    conv2_w=conv1d_w(co, co, 3), bn2=bn(co))

    def cblock(ci, co):
        return dict(conv1_w=conv2d_w(co, ci), bn1=bn(co),
                    conv2_w=conv2d_w(co, co), bn2=bn(co))

    return dict(
        pre_conv0_w=conv1d_w(64, 1, 11),
        pre_bn0=bn(64),
        pre_block1=pre_wav_block(64, 64),
        pre_block2=pre_wav_block(64, 128),
        pre_block3=pre_wav_block(128, 128),
        pre_block4=cblock(4, 64),
        conv_block2=cblock(64, 128),
        conv_block3=cblock(128, 256),
        conv_block4=cblock(256, 512),
        conv_block5=cblock(512, 1024),
        conv_block6=cblock(1024, 2048),
        fc1=linear(2048, 2048),
        fc_transfer=linear(2048, num_classes),
    )


# -----------------------------------------------------------------------------
# Full forward (eval mode)
# -----------------------------------------------------------------------------
def forward(prep, waveform):
    # waveform: (B, data_length)
    x = waveform[:, None, :].astype(jnp.float32)                    # (B, 1, L)

    # Wavegram front-end
    x = conv1d_bn_relu(x, prep["pre_conv0"], stride=5, padding=5, dilation=1)
    x = conv_pre_wav_block(x, prep["pre_block1"], 4)
    x = conv_pre_wav_block(x, prep["pre_block2"], 4)
    x = conv_pre_wav_block(x, prep["pre_block3"], 4)

    B, C, T = x.shape
    a1 = x.reshape(B, C // 32, 32, T).transpose(0, 1, 3, 2)         # (B, 4, T, 32)
    a1 = conv_block(a1, prep["pre_block4"], (2, 1))

    # CNN14 trunk (dropout / spec-augment / mixup are identity in eval mode)
    x = conv_block(a1, prep["conv_block2"], (2, 2))
    x = conv_block(x, prep["conv_block3"], (2, 2))
    x = conv_block(x, prep["conv_block4"], (2, 2))
    x = conv_block(x, prep["conv_block5"], (2, 2))
    x = conv_block(x, prep["conv_block6"], (1, 1))

    # Global pooling head (Pallas reduction kernel)
    pooled = head_pool(x)                                           # (B, 2048)

    embedding = fused_matmul_prepared(pooled, prep["fc1"],
                                      activation="relu", out_dtype=jnp.float32)
    clipwise = fused_matmul_prepared(embedding, prep["fc_transfer"],
                                     activation="none", out_dtype=jnp.float32)
    # clipwise_output is raw fc_transfer logits, matching the PyTorch wrapper (no sigmoid).
    return {"clipwise_output": clipwise, "embedding": embedding}


if __name__ == "__main__":
    key = jax.random.PRNGKey(0)
    k_data, k_param = jax.random.split(key)

    NUM_CLASSES = 10
    # data_length chosen so the wavegram time axis is 32 after the three /4 pools.
    waveform = 0.1 * jax.random.normal(k_data, (2, 10240), jnp.float32)

    params = init_params(k_param, NUM_CLASSES)
    prep = prepare_params(params)     # one-time BN fold + weight repack to bf16 (K, N)

    out = forward(prep, waveform)

    jax.block_until_ready(out["clipwise_output"])
    jax.block_until_ready(out["embedding"])
    assert out["embedding"].shape == (2, 2048)
    assert out["clipwise_output"].shape == (2, NUM_CLASSES)
    print("KERNEL_OK")
</pallas_src>

<mosaic_0001>
module attributes {stable_mosaic.version = 11 : i64} {
  func.func @_mm_kernel_single(%arg0: i32, %arg1: i32, %arg2: memref<256x128xbf16, #tpu.memory_space<vmem>>, %arg3: memref<128x128xbf16, #tpu.memory_space<vmem>>, %arg4: memref<1x128xf32, #tpu.memory_space<vmem>>, %arg5: memref<256x128xbf16, #tpu.memory_space<vmem>>) attributes {dimension_semantics = [#tpu.dimension_semantics<parallel>, #tpu.dimension_semantics<parallel>], iteration_bounds = array<i64: 16, 1>, scalar_prefetch = 0 : i64, scratch_operands = 0 : i64, tpu.core_type = #tpu.core_type<tc>, window_params = [{transform_indices = @transform_0, window_bounds = array<i64: 256, 128>}, {transform_indices = @transform_1, window_bounds = array<i64: 128, 128>}, {transform_indices = @transform_2, window_bounds = array<i64: 1, 128>}, {transform_indices = @transform_3, window_bounds = array<i64: 256, 128>}]} {
    %c0 = arith.constant 0 : index
    %c0_0 = arith.constant 0 : index
    %0 = vector.load %arg2[%c0, %c0_0] : memref<256x128xbf16, #tpu.memory_space<vmem>>, vector<256x128xbf16>
    %c0_1 = arith.constant 0 : index
    %c0_2 = arith.constant 0 : index
    %1 = vector.load %arg3[%c0_1, %c0_2] : memref<128x128xbf16, #tpu.memory_space<vmem>>, vector<128x128xbf16>
    %cst = arith.constant dense<0.000000e+00> : vector<256x128xf32>
    %2 = tpu.matmul %0, %1, %cst {dimension_numbers = #tpu.dot_dimension_numbers<[1], [0], [0], [1], [0, 0, 1, 1], [], []>} : vector<256x128xbf16>, vector<128x128xbf16>, vector<256x128xf32> -> vector<256x128xf32>
    %c0_3 = arith.constant 0 : index
    %c0_4 = arith.constant 0 : index
    %3 = vector.load %arg4[%c0_3, %c0_4] : memref<1x128xf32, #tpu.memory_space<vmem>>, vector<1x128xf32>
    %4 = vector.broadcast %3 : vector<1x128xf32> to vector<256x128xf32>
    %5 = arith.addf %2, %4 : vector<256x128xf32>
    %cst_5 = arith.constant 0.000000e+00 : f32
    %6 = vector.broadcast %cst_5 : f32 to vector<256x128xf32>
    %7 = arith.maximumf %5, %6 : vector<256x128xf32>
    %8 = arith.truncf %7 : vector<256x128xf32> to vector<256x128xbf16>
    %c0_6 = arith.constant 0 : index
    %c0_7 = arith.constant 0 : index
    %9 = vector.load %arg5[%c0_6, %c0_7] : memref<256x128xbf16, #tpu.memory_space<vmem>>, vector<256x128xbf16>
    tpu.vector_store %arg5[%c0_6, %c0_7], %8 {strides = array<i32>} : memref<256x128xbf16, #tpu.memory_space<vmem>>, vector<256x128xbf16>,
    return
  }
  func.func @transform_0(%arg0: i32, %arg1: i32) -> (i32, i32) {
    %c0_i32 = arith.constant 0 : i32
    %c0_i32_0 = arith.constant 0 : i32
    return %arg0, %c0_i32 : i32, i32
  }
  func.func @transform_1(%arg0: i32, %arg1: i32) -> (i32, i32) {
    %c0_i32 = arith.constant 0 : i32
    %c0_i32_0 = arith.constant 0 : i32
    return %c0_i32, %arg1 : i32, i32
  }
  func.func @transform_2(%arg0: i32, %arg1: i32) -> (i32, i32) {
    %c0_i32 = arith.constant 0 : i32
    %c0_i32_0 = arith.constant 0 : i32
    return %c0_i32, %arg1 : i32, i32
  }
  func.func @transform_3(%arg0: i32, %arg1: i32) -> (i32, i32) {
    %c0_i32 = arith.constant 0 : i32
    return %arg0, %arg1 : i32, i32
  }
}

</mosaic_0001>

<bundles_post_ra>
// kernel: tpu_custom_call.1
= control target key start
LH: loop header
LB: loop body
LE: loop exit
PB: predicated region body
PF: predicated region fallthrough
CT: control target
= control target key end

     0   :  { %s1491_s0 = inlined_call_operand.hbm [shape: bf16[4096,128], index: 0, kind: input, shape index: {}]   ;;  %s1492_s1 = inlined_call_operand.hbm [shape: bf16[128,128], index: 1, kind: input, shape index: {}]   ;;  %s1493_s2 = inlined_call_operand.vmem [shape: f32[1,128], index: 2, kind: input, shape index: {}]   ;;  %s1494_s3 = inlined_call_operand.hbm [shape: bf16[4096,128], index: 3, kind: output, shape index: {}]  }
   0x1   :  { %1496 = sst [smem:[#allocation11_spill]] %s1492_s1 }
   0x2   :  { %8 = vsyncpa [#allocation3], 0 }
   0x3   :  { %10 = vsyncpa [#allocation3 + $0x1], 0 }
   0x4   :  { %11 = vsyncpa [#allocation6], 0 }
   0x5   :  { %12 = vsyncpa [#allocation4], 0 }
   0x6   :  { %14 = vsyncpa [#allocation4 + $0x1], 0  ;;  %s1260_s12 = smov 0   ;;  %s1262_s13 = smov 0  }
   0x7   :  { %s1264_s14 = smov 0   ;;  %s1266_s15 = smov 0  }
   0x8   :  { %s1268_s16 = smov 0   ;;  %s1270_s17 = smov 0  }
   0x9 LB: > { %s750_s18 = sadd.s32 4294967295, %s1233_s17   ;;  %s751_s19 = sadd.s32 4294967294, %s1233_s17   ;;  %s1233_s17 = sphi %s1270_s17, %s20_s17   ;;  %s1229_s16 = sphi %s1268_s16, %s1510_s16   ;;  %s1225_s15 = sphi %s1266_s15, %s1509_s15   ;;  %s1221_s14 = sphi %s1264_s14, %s1508_s14   ;;  %s1217_s13 = sphi %s1262_s13, %s1507_s13   ;;  %s1213_s12 = sphi %s1260_s12, %s1506_s12  }
   0xa   : > { %p52_p0 = scmp.ne.s32.totalorder %s1217_s13, %s1213_s12  ;;  %p1294_p1 = scmp.eq.s32.totalorder %s750_s18, 0 }
   0xb   : > { %p1298_p2 = scmp.eq.s32.totalorder %s750_s18, 15  ;;  %p136_p3 = scmp.eq.s32.totalorder %s751_s19, 15 }
   0xc   : > { %p1304_p4 = por %p1294_p1, %p52_p0  ;;  %p752_p5 = scmp.ge.s32.totalorder %s1233_s17, 1 }
   0xd   : > { %p1309_p6 = por %p136_p3, %p52_p0  ;;  %p143_p7 = scmp.lt.s32.totalorder %s1233_s17, 17 }
   0xe   : > { %s1501_s1 = sld [smem:[#allocation11_spill]]  ;;  %s1235_s28 = smov [#allocation5]  }
   0xf   : > { %p1317_p8 = pnand %p752_p5, %p143_p7  ;;  %s158_s29 = sshll.u32 %s1235_s28, 4  ;;  %s159_s29 = int_to_ptr.vmem [resolvable:$true] %s158_s29 }
  0x10   : > { %s1495_s30 = smov 64   ;;  %s1237_s4 = smov 4  }
  0x11   : > { %p1017_p9 = pneg %p1317_p8  ;;  %s32_s5 = sadd.s32 1, %s1229_s16 }
  0x12   : > { %p34_p11 = scmp.ge.s32.totalorder %s32_s5, 16  ;;  %s39_s6 = sadd.s32 1, %s1221_s14 }
  0x13   : > { %p1018_p10 = pnand %p1017_p9, %p1294_p1  ;;  %p46_p12 = scmp.ne.s32.totalorder %s1221_s14, %s1217_s13 }
  0x14   : > { %s156_s26 = sshll.u32 %s1501_s1, 4  ;;  %p47_p13 = scmp.eq.s32.totalorder %s1233_s17, 0  ;;  %s157_s26 = int_to_ptr.hbm [resolvable:$true] %s156_s26 }
  0x15   : > { %1020 = dma.hbm_to_vmem [thread:$0]  (!%p1018_p10), %s157_s26, 1024, %s159_s29, [#allocation6], %s1495_s30, %s1495_s30, %s1237_s4  }
  0x16   : > { %s1512_s5 = smov (%p34_p11, %s32_s5), 0  ;;  %p1335_p0 = por %p47_p13, %p46_p12 }
  0x17   : > { %p1341_p3 = por %p1298_p2, %p46_p12  ;;  %s36_s9 = ssub.s32 %s1229_s16, %s1512_s5 }
  0x18   : > { %p1030_p5 = scmp.lt.s32.totalorder %s1233_s17, 16  ;;  %p37_p7 = scmp.eq.s32.totalorder %s36_s9, 0 }
  0x19   : > { %s178_s10 = sand.u32 1, %s1221_s14   ;;  %s864_s19 = sshll.u32 %s1229_s16, 7 }
  0x1a   : > { %s756_s11 = sshll.u32 %s178_s10, 7  ;;  %s187_s26 = scalar_lea.hbm %s1491_s0, %s864_s19 }
  0x1b   : > { %s1350_s18 = scalar_select %p37_p7, %s1221_s14, %s39_s6  }
  0x1c   : > { %s182_s28 = scalar_lea.vmem [#allocation2], %s756_s11  ;;  %s188_s21 = sshll.u32 %s187_s26, 4  ;;  %s189_s21 = int_to_ptr.hbm [resolvable:$true] %s188_s21 }
  0x1d   : > { %s190_s29 = sshll.u32 %s182_s28, 4  ;;  %p1022_p2 = pnand %p1030_p5, %p1335_p0  ;;  %s191_s29 = int_to_ptr.vmem [resolvable:$true] %s190_s29 }
  0x1e   : > { %s179_s30 = scalar_lea.sflag [#allocation3], %s178_s10  ;;  %s1505_s1 = smov 64  }
  0x1f   : > { %1024 = dma.hbm_to_vmem [thread:$0]  (!%p1022_p2), %s189_s21, 2048, %s191_s29, %s179_s30, %s1505_s1, %s1505_s1, %s1237_s4  }
  0x20   : > { %202 = sbr.rel (%p1317_p8) target bundleno = 272 (0x110), region = 32  ;;  %s1364_s6 = sand.u32 (!%p1317_p8), 1, %s1217_s13  }
  0x21   : > { %s760_s9 = sshll.u32 (!%p1317_p8), %s1364_s6, 7  ;;  %s205_s11 = scalar_lea.sflag (!%p1317_p8), [#allocation3], %s1364_s6 }
  0x22   : > { %s1370_s7 = scalar_lea.vmem (!%p1317_p8), [#allocation2], %s760_s9 }
  0x25   : > { %1200 = dma.done.wait (%p1304_p4), %s205_s11, 2048  }
  0x26   : > { %1202 = vsyncadd (%p1304_p4), %s205_s11, 4294965248 }
  0x27   : > { %1204 = dma.done.wait (%p1294_p1), [#allocation6], 1024  }
  0x28   : > { %1206 = vsyncadd (%p1294_p1), [#allocation6], 4294966272  ;;  %v888_v0 = vld [vmem:[#allocation5 + $0x38] sm:$0xff]  ;;  %v887_v1 = vld [vmem:[#allocation5 + $0x30] sm:$0xff]  ;;  %s1409_s22 = scalar_lea.vmem [#allocation7], %s760_s9  ;;  %s889_s27 = sshll.u32 %s1225_s15, 7 }
  0x29   : > { %441 = vmatpush.bf16.msra.mxu0 %v888_v0  ;;  %985 = vmatpush.bf16.msra.mxu1 %v888_v0  ;;  %v886_v2 = vld [vmem:[#allocation5 + $0x28] sm:$0xff]  ;;  %v885_v3 = vld [vmem:[#allocation5 + $0x20] sm:$0xff]  ;;  %v884_v4 = vld [vmem:[#allocation5 + $0x18] sm:$0xff]  ;;  %s639_s10 = scalar_lea.hbm %s1494_s3, %s889_s27  ;;  %s640_s15 = sshll.u32 %s1409_s22, 4  ;;  %s641_s15 = int_to_ptr.vmem [resolvable:$true] %s640_s15 }
  0x2a   : > { %986 = vmatpush.bf16.msra.mxu2 %v888_v0  ;;  %987 = vmatpush.bf16.msra.mxu3 %v888_v0  ;;  %v883_v5 = vld [vmem:[#allocation5 + $0x10] sm:$0xff]  ;;  %v882_v6 = vld [vmem:[#allocation5 + $0x8] sm:$0xff]  ;;  %v881_v7 = vld [vmem:[#allocation5] sm:$0xff]  ;;  %s642_s19 = sshll.u32 %s639_s10, 4  ;;  %s627_s24 = scalar_lea.sflag [#allocation4], %s1364_s6  ;;  %s643_s19 = int_to_ptr.hbm [resolvable:$true] %s642_s19 }
  0x2b   : > { %v865_v8 = vld [vmem:[%s1370_s7] sm:$0xff]  ;;  %v866_v12 = vld [vmem:[%s1370_s7 + $0x8] sm:$0xff]  ;;  %v867_v16 = vld [vmem:[%s1370_s7 + $0x10] sm:$0xff]  ;;  %s1161_s25 = sshra.s32 %s643_s19, 4  ;;  %s1167_s21 = scalar_lea.hbm %s1494_s3, 2048  ;;  %s1162_s25 = int_to_ptr.hbm [resolvable:$true] %s1161_s25 }
  0x2c   : > { %v869_v9 = vld [vmem:[%s1370_s7 + $0x20] sm:$0xff]  ;;  %v870_v13 = vld [vmem:[%s1370_s7 + $0x28] sm:$0xff]  ;;  %v871_v17 = vld [vmem:[%s1370_s7 + $0x30] sm:$0xff]  ;;  %s1163_s26 = scalar_lea.hbm %s1162_s25, 128  ;;  %p1168_p9 = scmp.lt.s32.totalorder %s1162_s25, %s1494_s3 }
  0x2d   : > { %442 = vmatpush.bf16.msra.mxu0 %v887_v1  ;;  %988 = vmatpush.bf16.msra.mxu1 %v887_v1  ;;  %v873_v10 = vld [vmem:[%s1370_s7 + $0x40] sm:$0xff]  ;;  %v874_v14 = vld [vmem:[%s1370_s7 + $0x48] sm:$0xff]  ;;  %v875_v18 = vld [vmem:[%s1370_s7 + $0x50] sm:$0xff]  ;;  %p1164_p1 = scmp.ne.s32.totalorder %s1162_s25, %s1163_s26  ;;  %p1169_p10 = scmp.lt.s32.totalorder %s1167_s21, %s1163_s26 }
  0x2e   : > { %989 = vmatpush.bf16.msra.mxu2 %v887_v1  ;;  %990 = vmatpush.bf16.msra.mxu3 %v887_v1  ;;  %v877_v11 = vld [vmem:[%s1370_s7 + $0x60] sm:$0xff]  ;;  %v878_v15 = vld [vmem:[%s1370_s7 + $0x68] sm:$0xff]  ;;  %v879_v19 = vld [vmem:[%s1370_s7 + $0x70] sm:$0xff] }
  0x2f   : > { %v868_v20 = vld [vmem:[%s1370_s7 + $0x18] sm:$0xff]  ;;  %v1399_v26 = vld [vmem:[%s1493_s2] ss:$0 sm:$0xff]  ;;  %p1165_p4 = pnand %p1164_p1, %p1341_p3  ;;  %p1170_p11 = por %p1169_p10, %p1168_p9 }
  0x30   : > { %v872_v21 = vld [vmem:[%s1370_s7 + $0x38] sm:$0xff] }
  0x31   : > { %443 = vmatpush.bf16.msra.mxu0 %v886_v2  ;;  %991 = vmatpush.bf16.msra.mxu1 %v886_v2  ;;  %v876_v22 = vld [vmem:[%s1370_s7 + $0x58] sm:$0xff]  ;;  %p1166_p8 = pneg %p1165_p4 }
  0x32   : > { %992 = vmatpush.bf16.msra.mxu2 %v886_v2  ;;  %993 = vmatpush.bf16.msra.mxu3 %v886_v2  ;;  %v880_v23 = vld [vmem:[%s1370_s7 + $0x78] sm:$0xff] }
  0x33   : > { %p1171_p12 = pnand %p1170_p11, %p1166_p8 }
  0x35   : > { %444 = vmatpush.bf16.msra.mxu0 %v885_v3  ;;  %994 = vmatpush.bf16.msra.mxu1 %v885_v3 }
  0x36   : > { %995 = vmatpush.bf16.msra.mxu2 %v885_v3  ;;  %996 = vmatpush.bf16.msra.mxu3 %v885_v3 }
  0x39   : > { %445 = vmatpush.bf16.msra.mxu0 %v884_v4  ;;  %997 = vmatpush.bf16.msra.mxu1 %v884_v4 }
  0x3a   : > { %998 = vmatpush.bf16.msra.mxu2 %v884_v4  ;;  %999 = vmatpush.bf16.msra.mxu3 %v884_v4 }
  0x3d   : > { %446 = vmatpush.bf16.msra.mxu0 %v883_v5  ;;  %1000 = vmatpush.bf16.msra.mxu1 %v883_v5 }
  0x3e   : > { %1001 = vmatpush.bf16.msra.mxu2 %v883_v5  ;;  %1002 = vmatpush.bf16.msra.mxu3 %v883_v5 }
  0x41   : > { %447 = vmatpush.bf16.msra.mxu0 %v882_v6  ;;  %1003 = vmatpush.bf16.msra.mxu1 %v882_v6 }
  0x42   : > { %1004 = vmatpush.bf16.msra.mxu2 %v882_v6  ;;  %1005 = vmatpush.bf16.msra.mxu3 %v882_v6 }
  0x45   : > { %448 = vmatpush.bf16.msra.mxu0 %v881_v7  ;;  %1006 = vmatpush.bf16.msra.mxu1 %v881_v7 }
  0x46   : > { %1007 = vmatpush.bf16.msra.mxu2 %v881_v7  ;;  %1008 = vmatpush.bf16.msra.mxu3 %v881_v7 }
  0x48   : > { %449 = vmatmul.bf16.vlgmr.msra.gmra.mxu0 %v865_v8  ;;  %469 = vmatmul.bf16.vlgmr.msra.gmra.mxu1 %v869_v9 }
  0x49   : > { %489 = vmatmul.bf16.vlgmr.msra.gmra.mxu2 %v873_v10  ;;  %509 = vmatmul.bf16.vlgmr.msra.gmra.mxu3 %v877_v11 }
  0x58   : > { %454 = vmatmul.bf16.gmra.mxu0 %v866_v12  ;;  %474 = vmatmul.bf16.gmra.mxu1 %v870_v13 }
  0x59   : > { %494 = vmatmul.bf16.gmra.mxu2 %v874_v14  ;;  %514 = vmatmul.bf16.gmra.mxu3 %v878_v15 }
  0x68   : > { %459 = vmatmul.bf16.gmra.mxu0 %v867_v16  ;;  %479 = vmatmul.bf16.gmra.mxu1 %v871_v17 }
  0x69   : > { %499 = vmatmul.bf16.gmra.mxu2 %v875_v18  ;;  %519 = vmatmul.bf16.gmra.mxu3 %v879_v19 }
  0x78   : > { %464 = vmatmul.bf16.gmra.mxu0 %v868_v20  ;;  %484 = vmatmul.bf16.gmra.mxu1 %v872_v21 }
  0x79   : > { %504 = vmatmul.bf16.gmra.mxu2 %v876_v22  ;;  %524 = vmatmul.bf16.gmra.mxu3 %v880_v23 }
  0xc5   : > { %v450_v24 = vpop.f32.mrf.mxu0  ;;  %v470_v25 = vpop.f32.mrf.mxu1 }
  0xc6   : > { %v451_v27 = vadd.f32 %v1399_v26, %v450_v24  ;;  %v471_v28 = vadd.f32 %v1399_v26, %v470_v25 }
  0xc8   : > { %v530_v35 = vmax.f32 %v451_v27, 0.0  ;;  %v538_v36 = vmax.f32 %v471_v28, 0.0 }
  0xcc   : > { %v490_v29 = vpop.f32.mrf.mxu2  ;;  %v510_v30 = vpop.f32.mrf.mxu3 }
  0xcd   : > { %v452_v31 = vpop.f32.mrf.mxu0  ;;  %v472_v32 = vpop.f32.mrf.mxu1  ;;  %v491_v41 = vadd.f32 %v1399_v26, %v490_v29  ;;  %v511_v42 = vadd.f32 %v1399_v26, %v510_v30 }
  0xce   : > { %v453_v33 = vadd.f32 %v1399_v26, %v452_v31  ;;  %v473_v34 = vadd.f32 %v1399_v26, %v472_v32 }
  0xcf   : > { %v546_v49 = vmax.f32 %v491_v41, 0.0  ;;  %v554_v50 = vmax.f32 %v511_v42, 0.0 }
  0xd0   : > { %v531_v37 = vmax.f32 %v453_v33, 0.0  ;;  %v539_v38 = vmax.f32 %v473_v34, 0.0 }
  0xd2   : > { %v893_v39 = vpack.c.bf16 %v531_v37, %v530_v35  ;;  %v913_v40 = vpack.c.bf16 %v539_v38, %v538_v36 }
  0xd4   : > { %894 = vst [vmem:[%s1409_s22] sm:$0xff] %v893_v39   ;;  %v492_v43 = vpop.f32.mrf.mxu2  ;;  %v512_v44 = vpop.f32.mrf.mxu3 }
  0xd5   : > { %973 = vst [vmem:[%s1409_s22 + $0x20] sm:$0xff] %v913_v40   ;;  %v493_v45 = vadd.f32 %v1399_v26, %v492_v43  ;;  %v513_v46 = vadd.f32 %v1399_v26, %v512_v44  ;;  %v455_v47 = vpop.f32.mrf.mxu0  ;;  %v475_v48 = vpop.f32.mrf.mxu1 }
  0xd6   : > { %v456_v55 = vadd.f32 %v1399_v26, %v455_v47  ;;  %v476_v56 = vadd.f32 %v1399_v26, %v475_v48 }
  0xd7   : > { %v547_v51 = vmax.f32 %v493_v45, 0.0  ;;  %v555_v52 = vmax.f32 %v513_v46, 0.0 }
  0xd8   : > { %v532_v63 = vmax.f32 %v456_v55, 0.0  ;;  %v540_v0 = vmax.f32 %v476_v56, 0.0 }
  0xd9   : > { %v933_v53 = vpack.c.bf16 %v547_v51, %v546_v49  ;;  %v953_v54 = vpack.c.bf16 %v555_v52, %v554_v50 }
  0xdb   : > { %977 = vst [vmem:[%s1409_s22 + $0x40] sm:$0xff] %v933_v53  }
  0xdc   : > { %981 = vst [vmem:[%s1409_s22 + $0x60] sm:$0xff] %v953_v54   ;;  %v495_v57 = vpop.f32.mrf.mxu2  ;;  %v515_v58 = vpop.f32.mrf.mxu3 }
  0xdd   : > { %v457_v59 = vpop.f32.mrf.mxu0  ;;  %v477_v60 = vpop.f32.mrf.mxu1  ;;  %v496_v5 = vadd.f32 %v1399_v26, %v495_v57  ;;  %v516_v6 = vadd.f32 %v1399_v26, %v515_v58 }
  0xde   : > { %v458_v61 = vadd.f32 %v1399_v26, %v457_v59  ;;  %v478_v62 = vadd.f32 %v1399_v26, %v477_v60 }
  0xdf   : > { %v548_v13 = vmax.f32 %v496_v5, 0.0  ;;  %v556_v14 = vmax.f32 %v516_v6, 0.0 }
  0xe0   : > { %v533_v1 = vmax.f32 %v458_v61, 0.0  ;;  %v541_v2 = vmax.f32 %v478_v62, 0.0 }
  0xe2   : > { %v898_v3 = vpack.c.bf16 %v533_v1, %v532_v63  ;;  %v918_v4 = vpack.c.bf16 %v541_v2, %v540_v0 }
  0xe4   : > { %970 = vst [vmem:[%s1409_s22 + $0x8] sm:$0xff] %v898_v3   ;;  %v497_v7 = vpop.f32.mrf.mxu2  ;;  %v517_v8 = vpop.f32.mrf.mxu3 }
  0xe5   : > { %974 = vst [vmem:[%s1409_s22 + $0x28] sm:$0xff] %v918_v4   ;;  %v498_v9 = vadd.f32 %v1399_v26, %v497_v7  ;;  %v518_v10 = vadd.f32 %v1399_v26, %v517_v8  ;;  %v460_v11 = vpop.f32.mrf.mxu0  ;;  %v480_v12 = vpop.f32.mrf.mxu1 }
  0xe6   : > { %v461_v19 = vadd.f32 %v1399_v26, %v460_v11  ;;  %v481_v20 = vadd.f32 %v1399_v26, %v480_v12 }
  0xe7   : > { %v549_v15 = vmax.f32 %v498_v9, 0.0  ;;  %v557_v16 = vmax.f32 %v518_v10, 0.0 }
  0xe8   : > { %v534_v28 = vmax.f32 %v461_v19, 0.0  ;;  %v542_v29 = vmax.f32 %v481_v20, 0.0 }
  0xe9   : > { %v938_v17 = vpack.c.bf16 %v549_v15, %v548_v13  ;;  %v958_v18 = vpack.c.bf16 %v557_v16, %v556_v14 }
  0xeb   : > { %978 = vst [vmem:[%s1409_s22 + $0x48] sm:$0xff] %v938_v17  }
  0xec   : > { %982 = vst [vmem:[%s1409_s22 + $0x68] sm:$0xff] %v958_v18   ;;  %v500_v21 = vpop.f32.mrf.mxu2  ;;  %v520_v22 = vpop.f32.mrf.mxu3 }
  0xed   : > { %v462_v23 = vpop.f32.mrf.mxu0  ;;  %v482_v24 = vpop.f32.mrf.mxu1  ;;  %v501_v34 = vadd.f32 %v1399_v26, %v500_v21  ;;  %v521_v35 = vadd.f32 %v1399_v26, %v520_v22 }
  0xee   : > { %v463_v25 = vadd.f32 %v1399_v26, %v462_v23  ;;  %v483_v27 = vadd.f32 %v1399_v26, %v482_v24 }
  0xef   : > { %v550_v42 = vmax.f32 %v501_v34, 0.0  ;;  %v558_v43 = vmax.f32 %v521_v35, 0.0 }
  0xf0   : > { %v535_v30 = vmax.f32 %v463_v25, 0.0  ;;  %v543_v31 = vmax.f32 %v483_v27, 0.0 }
  0xf2   : > { %v903_v32 = vpack.c.bf16 %v535_v30, %v534_v28  ;;  %v923_v33 = vpack.c.bf16 %v543_v31, %v542_v29 }
  0xf4   : > { %971 = vst [vmem:[%s1409_s22 + $0x10] sm:$0xff] %v903_v32   ;;  %v502_v36 = vpop.f32.mrf.mxu2  ;;  %v522_v37 = vpop.f32.mrf.mxu3 }
  0xf5   : > { %975 = vst [vmem:[%s1409_s22 + $0x30] sm:$0xff] %v923_v33   ;;  %v503_v38 = vadd.f32 %v1399_v26, %v502_v36  ;;  %v523_v39 = vadd.f32 %v1399_v26, %v522_v37  ;;  %v465_v40 = vpop.f32.mrf.mxu0  ;;  %v485_v41 = vpop.f32.mrf.mxu1 }
  0xf6   : > { %v466_v48 = vadd.f32 %v1399_v26, %v465_v40  ;;  %v486_v49 = vadd.f32 %v1399_v26, %v485_v41 }
  0xf7   : > { %v551_v44 = vmax.f32 %v503_v38, 0.0  ;;  %v559_v45 = vmax.f32 %v523_v39, 0.0 }
  0xf8   : > { %v536_v56 = vmax.f32 %v466_v48, 0.0  ;;  %v544_v57 = vmax.f32 %v486_v49, 0.0 }
  0xf9   : > { %v943_v46 = vpack.c.bf16 %v551_v44, %v550_v42  ;;  %v963_v47 = vpack.c.bf16 %v559_v45, %v558_v43 }
  0xfb   : > { %979 = vst [vmem:[%s1409_s22 + $0x50] sm:$0xff] %v943_v46  }
  0xfc   : > { %983 = vst [vmem:[%s1409_s22 + $0x70] sm:$0xff] %v963_v47   ;;  %v505_v50 = vpop.f32.mrf.mxu2  ;;  %v525_v51 = vpop.f32.mrf.mxu3 }
  0xfd   : > { %v467_v52 = vpop.f32.mrf.mxu0  ;;  %v487_v53 = vpop.f32.mrf.mxu1  ;;  %v506_v62 = vadd.f32 %v1399_v26, %v505_v50  ;;  %v526_v63 = vadd.f32 %v1399_v26, %v525_v51 }
  0xfe   : > { %v468_v54 = vadd.f32 %v1399_v26, %v467_v52  ;;  %v488_v55 = vadd.f32 %v1399_v26, %v487_v53 }
  0xff   : > { %v552_v4 = vmax.f32 %v506_v62, 0.0  ;;  %v560_v5 = vmax.f32 %v526_v63, 0.0 }
 0x100   : > { %v537_v58 = vmax.f32 %v468_v54, 0.0  ;;  %v545_v59 = vmax.f32 %v488_v55, 0.0 }
 0x102   : > { %v908_v60 = vpack.c.bf16 %v537_v58, %v536_v56  ;;  %v928_v61 = vpack.c.bf16 %v545_v59, %v544_v57 }
 0x104   : > { %972 = vst [vmem:[%s1409_s22 + $0x18] sm:$0xff] %v908_v60   ;;  %v507_v0 = vpop.f32.mrf.mxu2  ;;  %v527_v1 = vpop.f32.mrf.mxu3 }
 0x105   : > { %976 = vst [vmem:[%s1409_s22 + $0x38] sm:$0xff] %v928_v61   ;;  %v508_v2 = vadd.f32 %v1399_v26, %v507_v0  ;;  %v528_v3 = vadd.f32 %v1399_v26, %v527_v1 }
 0x107   : > { %v553_v6 = vmax.f32 %v508_v2, 0.0  ;;  %v561_v7 = vmax.f32 %v528_v3, 0.0 }
 0x109   : > { %v948_v8 = vpack.c.bf16 %v553_v6, %v552_v4  ;;  %v968_v9 = vpack.c.bf16 %v561_v7, %v560_v5 }
 0x10b   : > { %980 = vst [vmem:[%s1409_s22 + $0x58] sm:$0xff] %v948_v8  }
 0x10c   : > { %984 = vst [vmem:[%s1409_s22 + $0x78] sm:$0xff] %v968_v9  }
 0x10d   : > { %1174 = shalt.err (!%p1171_p12)
}
 0x10e   : > { %s1238_s6 = smov 64   ;;  %s1239_s7 = smov 4  }
 0x10f   : > { %1015 = dma.vmem_to_hbm [thread:$0]  (%p1341_p3), %s641_s15, 2048, %s643_s19, %s627_s24, %s1238_s6, %s1238_s6, %s1239_s7  }
 0x110 PF: > { %p1032_p13 = scmp.ge.s32.totalorder %s1233_s17, 2  ;;  %s657_s1 = sand.u32 1, %s1213_s12  }
 0x111   : > { %s658_s20 = scalar_lea.sflag [#allocation4], %s657_s1 }
 0x112   : > { %p1026_p0 = pnand %p1032_p13, %p1309_p6 }
 0x114   : > { %p1027_p5 = pneg %p1026_p0 }
 0x116   : > { %1208 = dma.done.wait (%p1027_p5), %s658_s20, 2048  }
 0x117   : > { %1210 = vsyncadd (%p1027_p5), %s658_s20, 4294965248  ;;  %s20_s17 = sadd.s32 1, %s1233_s17   ;;  %s1506_s12 = smov %s1217_s13 }
 0x118   : > { %p17_p7 = scmp.ge.s32.totalorder %s20_s17, 18   ;;  %s1507_s13 = smov %s1221_s14 }
 0x119   : > { %s1508_s14 = smov %s1350_s18  ;;  %s1509_s15 = smov %s1229_s16 }
 0x11a   : > { %s1510_s16 = smov %s1512_s5  ;;  %19 = sbr.rel (!%p17_p7) target bundleno = 9 (0x9), region = 85 }
 0x11f   :  { %664 = vsyncpa [#allocation3], 1 }
 0x120   :  { %666 = vsyncpa [#allocation3 + $0x1], 1 }
 0x121   :  { %667 = vsyncpa [#allocation6], 1 }
 0x122   :  { %668 = vsyncpa [#allocation4], 1 }
 0x123   :  { %670 = vsyncpa [#allocation4 + $0x1], 1 }

</bundles_post_ra>
